<compile_context>
chip_gen: v5e
topology: v5e:2x2
jax: 0.10.0
libtpu: 0.0.40
codegen_flags: <defaults>
</compile_context>

<pallas_src>
import jax
import jax.numpy as jnp
from jax.experimental import pallas as pl
from jax.experimental.pallas import tpu as pltpu

HIDDEN = 256


def _mlp_kernel(obs_ref,
                w1_ref, b1_ref,
                w2_ref, b2_ref,
                w3_ref, b3_ref,
                w4_ref, b4_ref,
                out_ref):
    """One batch tile of the fused 4-layer MLP."""
    x = obs_ref[...].astype(jnp.bfloat16)

    h = jnp.dot(x, w1_ref[...], preferred_element_type=jnp.float32) + b1_ref[...]
    h = jnp.maximum(h, 0.0)

    h = jnp.dot(h.astype(jnp.bfloat16), w2_ref[...],
                preferred_element_type=jnp.float32) + b2_ref[...]
    h = jnp.maximum(h, 0.0)

    h = jnp.dot(h.astype(jnp.bfloat16), w3_ref[...],
                preferred_element_type=jnp.float32) + b3_ref[...]
    h = jnp.maximum(h, 0.0)

    out = jnp.dot(h.astype(jnp.bfloat16), w4_ref[...],
                  preferred_element_type=jnp.float32) + b4_ref[...]
    out_ref[...] = out.astype(out_ref.dtype)


def actor_prior_bc_forward(obs, params, *, block_b=None):
    """Batch-tiled Pallas wrapper. Weights stay VMEM-resident across the grid."""
    B, obs_dim = obs.shape
    act_dim = int(params["action_scale"].shape[0])

    w1, b1 = params["w1"], params["b1"]
    w2, b2 = params["w2"], params["b2"]
    w3, b3 = params["w3"], params["b3"]
    w4, b4 = params["w4p"], params["b4p"]          # lane-dense padded (…, 128k)
    act_pad = w4.shape[1]

    # Batch tile: sublane-aligned (multiple of 8), large enough to amortize the
    # ~0.35us per-step pipeline overhead, small enough that obs/out tiles +
    # activations stay comfortably inside the tightest scoped-VMEM budgets
    # (v5e 16 MiB default, v7x 32/64 MiB).
    if block_b is None:
        block_b = min(1024, max(16, pl.next_power_of_2(B)))
    block_b = max(8, (block_b // 8) * 8)
    n_tiles = pl.cdiv(B, block_b)
    b_pad = n_tiles * block_b
    if b_pad != B:
        obs = jnp.pad(obs, ((0, b_pad - B), (0, 0)))

    def _const(i):          # resident weight/bias blocks: same block every step
        return (0, 0)

    def resident(arr):
        return pl.BlockSpec(arr.shape, _const)

    grid_spec = pltpu.PrefetchScalarGridSpec(
        num_scalar_prefetch=0,
        grid=(n_tiles,),
        in_specs=[
            pl.BlockSpec((block_b, obs_dim), lambda i: (i, 0)),
            resident(w1), resident(b1),
            resident(w2), resident(b2),
            resident(w3), resident(b3),
            resident(w4), resident(b4),
        ],
        out_specs=pl.BlockSpec((block_b, act_pad), lambda i: (i, 0)),
    )

    out_padded = pl.pallas_call(
        _mlp_kernel,
        out_shape=jax.ShapeDtypeStruct((b_pad, act_pad), jnp.float32),
        grid_spec=grid_spec,
        compiler_params=pltpu.CompilerParams(
            dimension_semantics=("parallel",),       # v7x: shard tiles across 2 TCs
            vmem_limit_bytes=32 * 1024 * 1024,       # safe on v5e/v6e/v7x budgets
        ),
    )(obs, w1, b1, w2, b2, w3, b3, w4, b4)

    # Strip batch padding and the lane-padding of the action dimension.
    return out_padded[:B, :act_dim]


def init_params(key, obs_dim, act_dim):
    """Deterministic synthetic init (PyTorch-Linear-like uniform fan-in scaling).
    Weights are stored transposed vs PyTorch ((in, out)) and cast to bf16; the
    last layer is zero-padded along the output axis up to a multiple of 128."""
    ks = jax.random.split(key, 8)

    def lin(kw, kb, fan_in, fan_out):
        bound = 1.0 / float(fan_in) ** 0.5
        w = jax.random.uniform(kw, (fan_in, fan_out), jnp.float32, -bound, bound)
        b = jax.random.uniform(kb, (1, fan_out), jnp.float32, -bound, bound)
        return w, b

    w1, b1 = lin(ks[0], ks[1], obs_dim, HIDDEN)
    w2, b2 = lin(ks[2], ks[3], HIDDEN, HIDDEN)
    w3, b3 = lin(ks[4], ks[5], HIDDEN, HIDDEN)
    w4, b4 = lin(ks[6], ks[7], HIDDEN, act_dim)

    act_pad = pl.cdiv(act_dim, 128) * 128
    w4p = jnp.pad(w4, ((0, 0), (0, act_pad - act_dim)))
    b4p = jnp.pad(b4, ((0, 0), (0, act_pad - act_dim)))

    params = dict(
        w1=w1.astype(jnp.bfloat16), b1=b1,
        w2=w2.astype(jnp.bfloat16), b2=b2,
        w3=w3.astype(jnp.bfloat16), b3=b3,
        w4p=w4p.astype(jnp.bfloat16), b4p=b4p,
        # action_scale / action_bias exist in the module but are NOT used in forward().
        action_scale=jnp.ones((act_dim,), jnp.float32),
        action_bias=jnp.zeros((act_dim,), jnp.float32),
    )
    return params


def reference_forward(obs, p):
    """Pure-JAX reference mirroring the kernel's bf16-input / f32-accumulate math."""
    act_dim = int(p["action_scale"].shape[0])

    def dot_bf16(x, w):
        return jnp.dot(x.astype(jnp.bfloat16), w, preferred_element_type=jnp.float32)

    h = jnp.maximum(dot_bf16(obs, p["w1"]) + p["b1"], 0.0)
    h = jnp.maximum(dot_bf16(h, p["w2"]) + p["b2"], 0.0)
    h = jnp.maximum(dot_bf16(h, p["w3"]) + p["b3"], 0.0)
    out = dot_bf16(h, p["w4p"]) + p["b4p"]
    return out[:, :act_dim]


if __name__ == "__main__":
    key = jax.random.PRNGKey(0)
    k_obs, k_obs2, k_par = jax.random.split(key, 3)

    batch, obs_dim, act_dim = 2, 32, 8
    obs = jax.random.normal(k_obs, (batch, obs_dim), jnp.float32)
    params = init_params(k_par, obs_dim, act_dim)

    out = actor_prior_bc_forward(obs, params)
    out = jax.block_until_ready(out)
    ref = reference_forward(obs, params)
    assert out.shape == (batch, act_dim)
    assert jnp.allclose(out, ref, atol=1e-3, rtol=1e-3), "mismatch vs reference (small batch)"

    # Exercise the batch-tiled grid path (multiple tiles + remainder padding).
    big_batch = 1000
    obs_big = jax.random.normal(k_obs2, (big_batch, obs_dim), jnp.float32)
    out_big = jax.block_until_ready(
        actor_prior_bc_forward(obs_big, params, block_b=512))
    ref_big = reference_forward(obs_big, params)
    assert out_big.shape == (big_batch, act_dim)
    assert jnp.allclose(out_big, ref_big, atol=1e-3, rtol=1e-3), "mismatch vs reference (tiled batch)"

    # TODO(synk): get_action (tanh * action_scale + action_bias) is intentionally not
    # part of forward(); it can be applied in the wrapper if needed.

    print("KERNEL_OK")
</pallas_src>

<mosaic_0001>
module attributes {stable_mosaic.version = 11 : i64} {
  func.func @_mlp_kernel(%arg0: i32, %arg1: memref<16x32xf32, #tpu.memory_space<vmem>>, %arg2: memref<32x256xbf16, #tpu.memory_space<vmem>>, %arg3: memref<1x256xf32, #tpu.memory_space<vmem>>, %arg4: memref<256x256xbf16, #tpu.memory_space<vmem>>, %arg5: memref<1x256xf32, #tpu.memory_space<vmem>>, %arg6: memref<256x256xbf16, #tpu.memory_space<vmem>>, %arg7: memref<1x256xf32, #tpu.memory_space<vmem>>, %arg8: memref<256x128xbf16, #tpu.memory_space<vmem>>, %arg9: memref<1x128xf32, #tpu.memory_space<vmem>>, %arg10: memref<16x128xf32, #tpu.memory_space<vmem>>) attributes {dimension_semantics = [#tpu.dimension_semantics<parallel>], iteration_bounds = array<i64: 1>, scalar_prefetch = 0 : i64, scratch_operands = 0 : i64, tpu.core_type = #tpu.core_type<tc>, window_params = [{transform_indices = @transform_0, window_bounds = array<i64: 16, 32>}, {pipeline_mode = #tpu.pipeline_mode<synchronous>, transform_indices = @transform_1, window_bounds = array<i64: 32, 256>}, {pipeline_mode = #tpu.pipeline_mode<synchronous>, transform_indices = @transform_2, window_bounds = array<i64: 1, 256>}, {pipeline_mode = #tpu.pipeline_mode<synchronous>, transform_indices = @transform_3, window_bounds = array<i64: 256, 256>}, {pipeline_mode = #tpu.pipeline_mode<synchronous>, transform_indices = @transform_4, window_bounds = array<i64: 1, 256>}, {pipeline_mode = #tpu.pipeline_mode<synchronous>, transform_indices = @transform_5, window_bounds = array<i64: 256, 256>}, {pipeline_mode = #tpu.pipeline_mode<synchronous>, transform_indices = @transform_6, window_bounds = array<i64: 1, 256>}, {pipeline_mode = #tpu.pipeline_mode<synchronous>, transform_indices = @transform_7, window_bounds = array<i64: 256, 128>}, {pipeline_mode = #tpu.pipeline_mode<synchronous>, transform_indices = @transform_8, window_bounds = array<i64: 1, 128>}, {transform_indices = @transform_9, window_bounds = array<i64: 16, 128>}]} {
    %c0 = arith.constant 0 : index
    %c0_0 = arith.constant 0 : index
    %0 = vector.load %arg1[%c0, %c0_0] : memref<16x32xf32, #tpu.memory_space<vmem>>, vector<16x32xf32>
    %1 = arith.truncf %0 : vector<16x32xf32> to vector<16x32xbf16>
    %c0_1 = arith.constant 0 : index
    %c0_2 = arith.constant 0 : index
    %2 = vector.load %arg2[%c0_1, %c0_2] : memref<32x256xbf16, #tpu.memory_space<vmem>>, vector<32x256xbf16>
    %cst = arith.constant dense<0.000000e+00> : vector<16x256xf32>
    %3 = tpu.matmul %1, %2, %cst {dimension_numbers = #tpu.dot_dimension_numbers<[1], [0], [0], [1], [0, 0, 1, 1], [], []>} : vector<16x32xbf16>, vector<32x256xbf16>, vector<16x256xf32> -> vector<16x256xf32>
    %c0_3 = arith.constant 0 : index
    %c0_4 = arith.constant 0 : index
    %4 = vector.load %arg3[%c0_3, %c0_4] : memref<1x256xf32, #tpu.memory_space<vmem>>, vector<1x256xf32>
    %5 = vector.broadcast %4 : vector<1x256xf32> to vector<16x256xf32>
    %6 = arith.addf %3, %5 : vector<16x256xf32>
    %cst_5 = arith.constant 0.000000e+00 : f32
    %7 = vector.broadcast %cst_5 : f32 to vector<16x256xf32>
    %8 = arith.maximumf %6, %7 : vector<16x256xf32>
    %9 = arith.truncf %8 : vector<16x256xf32> to vector<16x256xbf16>
    %c0_6 = arith.constant 0 : index
    %c0_7 = arith.constant 0 : index
    %10 = vector.load %arg4[%c0_6, %c0_7] : memref<256x256xbf16, #tpu.memory_space<vmem>>, vector<256x256xbf16>
    %cst_8 = arith.constant dense<0.000000e+00> : vector<16x256xf32>
    %11 = tpu.matmul %9, %10, %cst_8 {dimension_numbers = #tpu.dot_dimension_numbers<[1], [0], [0], [1], [0, 0, 1, 1], [], []>} : vector<16x256xbf16>, vector<256x256xbf16>, vector<16x256xf32> -> vector<16x256xf32>
    %c0_9 = arith.constant 0 : index
    %c0_10 = arith.constant 0 : index
    %12 = vector.load %arg5[%c0_9, %c0_10] : memref<1x256xf32, #tpu.memory_space<vmem>>, vector<1x256xf32>
    %13 = vector.broadcast %12 : vector<1x256xf32> to vector<16x256xf32>
    %14 = arith.addf %11, %13 : vector<16x256xf32>
    %cst_11 = arith.constant 0.000000e+00 : f32
    %15 = vector.broadcast %cst_11 : f32 to vector<16x256xf32>
    %16 = arith.maximumf %14, %15 : vector<16x256xf32>
    %17 = arith.truncf %16 : vector<16x256xf32> to vector<16x256xbf16>
    %c0_12 = arith.constant 0 : index
    %c0_13 = arith.constant 0 : index
    %18 = vector.load %arg6[%c0_12, %c0_13] : memref<256x256xbf16, #tpu.memory_space<vmem>>, vector<256x256xbf16>
    %cst_14 = arith.constant dense<0.000000e+00> : vector<16x256xf32>
    %19 = tpu.matmul %17, %18, %cst_14 {dimension_numbers = #tpu.dot_dimension_numbers<[1], [0], [0], [1], [0, 0, 1, 1], [], []>} : vector<16x256xbf16>, vector<256x256xbf16>, vector<16x256xf32> -> vector<16x256xf32>
    %c0_15 = arith.constant 0 : index
    %c0_16 = arith.constant 0 : index
    %20 = vector.load %arg7[%c0_15, %c0_16] : memref<1x256xf32, #tpu.memory_space<vmem>>, vector<1x256xf32>
    %21 = vector.broadcast %20 : vector<1x256xf32> to vector<16x256xf32>
    %22 = arith.addf %19, %21 : vector<16x256xf32>
    %cst_17 = arith.constant 0.000000e+00 : f32
    %23 = vector.broadcast %cst_17 : f32 to vector<16x256xf32>
    %24 = arith.maximumf %22, %23 : vector<16x256xf32>
    %25 = arith.truncf %24 : vector<16x256xf32> to vector<16x256xbf16>
    %c0_18 = arith.constant 0 : index
    %c0_19 = arith.constant 0 : index
    %26 = vector.load %arg8[%c0_18, %c0_19] : memref<256x128xbf16, #tpu.memory_space<vmem>>, vector<256x128xbf16>
    %cst_20 = arith.constant dense<0.000000e+00> : vector<16x128xf32>
    %27 = tpu.matmul %25, %26, %cst_20 {dimension_numbers = #tpu.dot_dimension_numbers<[1], [0], [0], [1], [0, 0, 1, 1], [], []>} : vector<16x256xbf16>, vector<256x128xbf16>, vector<16x128xf32> -> vector<16x128xf32>
    %c0_21 = arith.constant 0 : index
    %c0_22 = arith.constant 0 : index
    %28 = vector.load %arg9[%c0_21, %c0_22] : memref<1x128xf32, #tpu.memory_space<vmem>>, vector<1x128xf32>
    %29 = vector.broadcast %28 : vector<1x128xf32> to vector<16x128xf32>
    %30 = arith.addf %27, %29 : vector<16x128xf32>
    %c0_23 = arith.constant 0 : index
    %c0_24 = arith.constant 0 : index
    %31 = vector.load %arg10[%c0_23, %c0_24] : memref<16x128xf32, #tpu.memory_space<vmem>>, vector<16x128xf32>
    tpu.vector_store %arg10[%c0_23, %c0_24], %30 {strides = array<i32>} : memref<16x128xf32, #tpu.memory_space<vmem>>, vector<16x128xf32>,
    return
  }
  func.func @transform_0(%arg0: i32) -> (i32, i32) {
    %c0_i32 = arith.constant 0 : i32
    %c0_i32_0 = arith.constant 0 : i32
    return %arg0, %c0_i32 : i32, i32
  }
  func.func @transform_1(%arg0: i32) -> (i32, i32) {
    %c0_i32 = arith.constant 0 : i32
    %c0_i32_0 = arith.constant 0 : i32
    %c0_i32_1 = arith.constant 0 : i32
    return %c0_i32, %c0_i32_0 : i32, i32
  }
  func.func @transform_2(%arg0: i32) -> (i32, i32) {
    %c0_i32 = arith.constant 0 : i32
    %c0_i32_0 = arith.constant 0 : i32
    %c0_i32_1 = arith.constant 0 : i32
    return %c0_i32, %c0_i32_0 : i32, i32
  }
  func.func @transform_3(%arg0: i32) -> (i32, i32) {
    %c0_i32 = arith.constant 0 : i32
    %c0_i32_0 = arith.constant 0 : i32
    %c0_i32_1 = arith.constant 0 : i32
    return %c0_i32, %c0_i32_0 : i32, i32
  }
  func.func @transform_4(%arg0: i32) -> (i32, i32) {
    %c0_i32 = arith.constant 0 : i32
    %c0_i32_0 = arith.constant 0 : i32
    %c0_i32_1 = arith.constant 0 : i32
    return %c0_i32, %c0_i32_0 : i32, i32
  }
  func.func @transform_5(%arg0: i32) -> (i32, i32) {
    %c0_i32 = arith.constant 0 : i32
    %c0_i32_0 = arith.constant 0 : i32
    %c0_i32_1 = arith.constant 0 : i32
    return %c0_i32, %c0_i32_0 : i32, i32
  }
  func.func @transform_6(%arg0: i32) -> (i32, i32) {
    %c0_i32 = arith.constant 0 : i32
    %c0_i32_0 = arith.constant 0 : i32
    %c0_i32_1 = arith.constant 0 : i32
    return %c0_i32, %c0_i32_0 : i32, i32
  }
  func.func @transform_7(%arg0: i32) -> (i32, i32) {
    %c0_i32 = arith.constant 0 : i32
    %c0_i32_0 = arith.constant 0 : i32
    %c0_i32_1 = arith.constant 0 : i32
    return %c0_i32, %c0_i32_0 : i32, i32
  }
  func.func @transform_8(%arg0: i32) -> (i32, i32) {
    %c0_i32 = arith.constant 0 : i32
    %c0_i32_0 = arith.constant 0 : i32
    %c0_i32_1 = arith.constant 0 : i32
    return %c0_i32, %c0_i32_0 : i32, i32
  }
  func.func @transform_9(%arg0: i32) -> (i32, i32) {
    %c0_i32 = arith.constant 0 : i32
    %c0_i32_0 = arith.constant 0 : i32
    return %arg0, %c0_i32 : i32, i32
  }
}

</mosaic_0001>

<bundles_post_ra>
// kernel: tpu_custom_call.1
= control target key start
LH: loop header
LB: loop body
LE: loop exit
PB: predicated region body
PF: predicated region fallthrough
CT: control target
= control target key end

     0   :  { %14 = vsyncpa [#allocation3], 0  ;;  %s1621_s0 = inlined_call_operand.hbm [shape: f32[16,32], index: 0, kind: input, shape index: {}]   ;;  %s1622_s1 = inlined_call_operand.hbm [shape: bf16[32,256], index: 1, kind: input, shape index: {}]   ;;  %s1623_s2 = inlined_call_operand.hbm [shape: f32[1,256], index: 2, kind: input, shape index: {}]   ;;  %s1624_s3 = inlined_call_operand.hbm [shape: bf16[256,256], index: 3, kind: input, shape index: {}]   ;;  %s1625_s4 = inlined_call_operand.vmem [shape: f32[1,256], index: 4, kind: input, shape index: {}]   ;;  %s1626_s5 = inlined_call_operand.hbm [shape: bf16[256,256], index: 5, kind: input, shape index: {}]   ;;  %s1627_s6 = inlined_call_operand.vmem [shape: f32[1,256], index: 6, kind: input, shape index: {}]   ;;  %s1628_s7 = inlined_call_operand.hbm [shape: bf16[256,128], index: 7, kind: input, shape index: {}]   ;;  %s1629_s8 = inlined_call_operand.vmem [shape: f32[1,128], index: 8, kind: input, shape index: {}]   ;;  %s1630_s9 = inlined_call_operand.hbm [shape: f32[16,128], index: 9, kind: output, shape index: {}]  }
   0x1   :  { %15 = vsyncpa [#allocation6], 0 }
   0x2   :  { %16 = vsyncpa [#allocation9], 0 }
   0x3   :  { %17 = vsyncpa [#allocation12], 0 }
   0x4   :  { %18 = vsyncpa [#allocation4], 0  ;;  %s36_s11 = sshll.u32 %s1622_s1, 4  ;;  %s1513_s12 = smov [#allocation5]   ;;  %s37_s11 = int_to_ptr.hbm [resolvable:$true] %s36_s11 }
   0x5   :  { %s38_s13 = sshll.u32 %s1513_s12, 4  ;;  %s60_s16 = sshll.u32 %s1624_s3, 4  ;;  %s39_s13 = int_to_ptr.vmem [resolvable:$true] %s38_s13  ;;  %s61_s16 = int_to_ptr.hbm [resolvable:$true] %s60_s16 }
   0x6   :  { %s1514_s17 = smov 128   ;;  %s1515_s18 = smov 8  }
   0x7   :  { %44 = dma.hbm_to_vmem [thread:$0]  %s37_s11, 512, %s39_s13, [#allocation6], %s1514_s17, %s1514_s17, %s1515_s18  }
   0x8   :  { %s1516_s19 = smov [#allocation8]   ;;  %s23_s1 = sshll.u32 %s1621_s0, 4  ;;  %s24_s1 = int_to_ptr.hbm [resolvable:$true] %s23_s1 }
   0x9   :  { %s62_s20 = sshll.u32 %s1516_s19, 4  ;;  %s50_s24 = sshll.u32 %s1623_s2, 4  ;;  %s63_s20 = int_to_ptr.vmem [resolvable:$true] %s62_s20  ;;  %s51_s24 = int_to_ptr.hbm [resolvable:$true] %s50_s24 }
   0xa   :  { %68 = dma.hbm_to_vmem [thread:$0]  %s61_s16, 4096, %s63_s20, [#allocation9], %s1514_s17, %s1514_s17, %s1515_s18  }
   0xb   :  { %s1517_s25 = smov [#allocation2]   ;;  %s1518_s27 = smov [#allocation7]  }
   0xc   :  { %s25_s26 = sshll.u32 %s1517_s25, 4  ;;  %s52_s0 = sshll.u32 %s1518_s27, 4  ;;  %s26_s26 = int_to_ptr.vmem [resolvable:$true] %s25_s26  ;;  %s53_s0 = int_to_ptr.vmem [resolvable:$true] %s52_s0 }
   0xd   :  { %31 = dma.hbm_to_vmem [thread:$0]  %s24_s1, 256, %s26_s26, [#allocation3], %s1514_s17, %s1514_s17, %s1515_s18  }
   0xe   :  { %s75_s30 = sshll.u32 %s1626_s5, 4  ;;  %s90_s2 = sshll.u32 %s1628_s7, 4  ;;  %s76_s30 = int_to_ptr.hbm [resolvable:$true] %s75_s30  ;;  %s91_s2 = int_to_ptr.hbm [resolvable:$true] %s90_s2 }
   0xf   :  { %55 = dma.hbm_to_vmem [thread:$0]  %s51_s24, 32, %s53_s0, [#allocation6]  }
  0x10   :  { %s1519_s12 = smov [#allocation10]   ;;  %s1520_s14 = smov [#allocation11]  }
  0x11   :  { %s77_s13 = sshll.u32 %s1519_s12, 4  ;;  %s92_s15 = sshll.u32 %s1520_s14, 4  ;;  %s78_s13 = int_to_ptr.vmem [resolvable:$true] %s77_s13  ;;  %s93_s15 = int_to_ptr.vmem [resolvable:$true] %s92_s15 }
  0x12   :  { %83 = dma.hbm_to_vmem [thread:$0]  %s76_s30, 4096, %s78_s13, [#allocation9], %s1514_s17, %s1514_s17, %s1515_s18  }
  0x13   :  { %s1521_s16 = smov 64   ;;  %s1522_s5 = smov 4  }
  0x14   :  { %98 = dma.hbm_to_vmem [thread:$0]  %s91_s2, 2048, %s93_s15, [#allocation12], %s1521_s16, %s1521_s16, %s1522_s5  }
  0x15   :  { %1503 = dma.done.wait [#allocation3], 256  }
  0x16   :  { %1504 = vsyncadd [#allocation3], 4294967040 }
  0x17   :  { %1505 = dma.done.wait [#allocation6], 544  }
  0x18   :  { %1506 = vsyncadd [#allocation6], 4294966752 }
  0x19   :  { %1507 = dma.done.wait [#allocation9], 8192  }
  0x1a   :  { %1508 = vsyncadd [#allocation9], 4294959104 }
  0x1b   :  { %1509 = dma.done.wait [#allocation12], 2048  }
  0x1c   :  { %1510 = vsyncadd [#allocation12], 4294965248  ;;  %v911_v0 = vld [vmem:[#allocation5 + $0x10] sm:$0xf]  ;;  %v1242_v1 = vld [vmem:[#allocation5 + $0x14] sm:$0xf0] }
  0x1d   :  { %v1241_v2 = vld [vmem:[#allocation5 + $0x14] sm:$0xf]  ;;  %v912_v3 = vor.u32 %v1242_v1, %v911_v0  ;;  %v913_v4 = vld [vmem:[#allocation5 + $0x18] sm:$0xf0]  ;;  %v903_v5 = vld [vmem:[#allocation5] sm:$0xf] }
  0x1e   :  { %v1240_v6 = vld [vmem:[#allocation5 + $0x4] sm:$0xf0]  ;;  %v916_v7 = vor.u32 %v1241_v2, %v913_v4  ;;  %v1239_v8 = vld [vmem:[#allocation5 + $0x4] sm:$0xf]  ;;  %v905_v9 = vld [vmem:[#allocation5 + $0x8] sm:$0xf0] }
  0x1f   :  { %v126_v10 = vld [vmem:[#allocation2] sm:$0xff]  ;;  %169 = vmatpush.bf16.msra.mxu0 %v912_v3  ;;  %v904_v11 = vor.u32 %v1240_v6, %v903_v5  ;;  %v127_v12 = vld [vmem:[#allocation2 + $0x8] sm:$0xff]  ;;  %vm159_vm0 = vcmask 261120   ;;  %v908_v15 = vor.u32 %v1239_v8, %v905_v9  ;;  %v969_v27 = vld [vmem:[#allocation8 + $0x60] sm:$0xf]  ;;  %s1523_s22 = smov [#allocation13]  }
  0x20   :  { %v977_v13 = vld [vmem:[#allocation8 + $0x70] sm:$0xf]  ;;  %v1258_v14 = vld [vmem:[#allocation8 + $0x74] sm:$0xf0]  ;;  %183 = vmatpush.bf16.msra.mxu1 %v916_v7  ;;  %v1257_v19 = vld [vmem:[#allocation8 + $0x74] sm:$0xf]  ;;  %v128_v24 = vpack.c.bf16 %v127_v12, %v126_v10 }
  0x21   :  { %v978_v16 = vor.u32 %v1258_v14, %v977_v13  ;;  %v1041_v17 = vld [vmem:[#allocation8 + $0xf0] sm:$0xf]  ;;  %v1274_v18 = vld [vmem:[#allocation8 + $0xf4] sm:$0xf0]  ;;  %v979_v21 = vld [vmem:[#allocation8 + $0x78] sm:$0xf0] }
  0x22   :  { %v1042_v20 = vor.u32 %v1274_v18, %v1041_v17  ;;  %v1273_v22 = vld [vmem:[#allocation8 + $0xf4] sm:$0xf]  ;;  %v1043_v23 = vld [vmem:[#allocation8 + $0xf8] sm:$0xf0]  ;;  %v982_v25 = vor.u32 %v1257_v19, %v979_v21  ;;  %v1256_v28 = vld [vmem:[#allocation8 + $0x64] sm:$0xf0] }
  0x23   :  { %395 = vmatpush.bf16.msra.mxu2 %v978_v16  ;;  %v1046_v26 = vor.u32 %v1273_v22, %v1043_v23  ;;  %v1033_v29 = vld [vmem:[#allocation8 + $0xe0] sm:$0xf]  ;;  %170 = vmatpush.bf16.msra.mxu0 %v904_v11  ;;  %v970_v30 = vor.u32 %v1256_v28, %v969_v27  ;;  %v1272_v31 = vld [vmem:[#allocation8 + $0xe4] sm:$0xf0]  ;;  %v1255_v32 = vld [vmem:[#allocation8 + $0x64] sm:$0xf] }
  0x24   :  { %409 = vmatpush.bf16.msra.mxu3 %v1042_v20  ;;  %v971_v33 = vld [vmem:[#allocation8 + $0x68] sm:$0xf0]  ;;  %184 = vmatpush.bf16.msra.mxu1 %v908_v15  ;;  %v1034_v34 = vor.u32 %v1272_v31, %v1033_v29  ;;  %v1271_v36 = vld [vmem:[#allocation8 + $0xe4] sm:$0xf]  ;;  %v961_v38 = vld [vmem:[#allocation8 + $0x50] sm:$0xf] }
  0x25   :  { %v974_v35 = vor.u32 %v1255_v32, %v971_v33  ;;  %v1035_v37 = vld [vmem:[#allocation8 + $0xe8] sm:$0xf0]  ;;  %v1254_v40 = vld [vmem:[#allocation8 + $0x54] sm:$0xf0]  ;;  %v1025_v41 = vld [vmem:[#allocation8 + $0xd0] sm:$0xf] }
  0x26   :  { %v1038_v39 = vor.u32 %v1271_v36, %v1035_v37  ;;  %v1270_v42 = vld [vmem:[#allocation8 + $0xd4] sm:$0xf0]  ;;  %917 = vmatmul.msk.bf16.vlgmr.msra.gmra.mxu0 %vm159_vm0, %v128_v24  ;;  %v962_v43 = vor.u32 %v1254_v40, %v961_v38  ;;  %v1253_v44 = vld [vmem:[#allocation8 + $0x54] sm:$0xf]  ;;  %v963_v45 = vld [vmem:[#allocation8 + $0x58] sm:$0xf0] }
  0x27   :  { %423 = vmatpush.bf16.msrb.mxu0 %v982_v25  ;;  %396 = vmatpush.bf16.msra.mxu2 %v970_v30  ;;  %v1269_v46 = vld [vmem:[#allocation8 + $0xd4] sm:$0xf]  ;;  %v1026_v47 = vor.u32 %v1270_v42, %v1025_v41  ;;  %v1027_v48 = vld [vmem:[#allocation8 + $0xd8] sm:$0xf0]  ;;  %v953_v49 = vld [vmem:[#allocation8 + $0x40] sm:$0xf]  ;;  %v966_v51 = vor.u32 %v1253_v44, %v963_v45 }
  0x28   :  { %437 = vmatpush.bf16.msrb.mxu1 %v1046_v26  ;;  %410 = vmatpush.bf16.msra.mxu3 %v1034_v34  ;;  %v1252_v50 = vld [vmem:[#allocation8 + $0x44] sm:$0xf0]  ;;  %v1017_v52 = vld [vmem:[#allocation8 + $0xc0] sm:$0xf]  ;;  %v1030_v54 = vor.u32 %v1269_v46, %v1027_v48  ;;  %v1251_v55 = vld [vmem:[#allocation8 + $0x44] sm:$0xf] }
  0x29   :  { %918 = vmatmul.msk.bf16.vlgmr.msra.gmra.mxu1 %vm159_vm0, %v128_v24  ;;  %v1268_v53 = vld [vmem:[#allocation8 + $0xc4] sm:$0xf0]  ;;  %v955_v56 = vld [vmem:[#allocation8 + $0x48] sm:$0xf0]  ;;  %v954_v57 = vor.u32 %v1252_v50, %v953_v49  ;;  %v1267_v58 = vld [vmem:[#allocation8 + $0xc4] sm:$0xf] }
  0x2a   :  { %v1019_v59 = vld [vmem:[#allocation8 + $0xc8] sm:$0xf0]  ;;  %v1018_v60 = vor.u32 %v1268_v53, %v1017_v52  ;;  %v958_v61 = vor.u32 %v1251_v55, %v955_v56  ;;  %v945_v63 = vld [vmem:[#allocation8 + $0x30] sm:$0xf]  ;;  %v1250_v0 = vld [vmem:[#allocation8 + $0x34] sm:$0xf0] }
  0x2b   :  { %424 = vmatpush.bf16.msrb.mxu0 %v974_v35  ;;  %397 = vmatpush.bf16.msra.mxu2 %v962_v43  ;;  %v1022_v62 = vor.u32 %v1267_v58, %v1019_v59  ;;  %v1009_v1 = vld [vmem:[#allocation8 + $0xb0] sm:$0xf]  ;;  %v946_v2 = vor.u32 %v1250_v0, %v945_v63  ;;  %v1266_v3 = vld [vmem:[#allocation8 + $0xb4] sm:$0xf0]  ;;  %v1249_v4 = vld [vmem:[#allocation8 + $0x34] sm:$0xf] }
  0x2c   :  { %438 = vmatpush.bf16.msrb.mxu1 %v1038_v39  ;;  %411 = vmatpush.bf16.msra.mxu3 %v1026_v47  ;;  %v947_v5 = vld [vmem:[#allocation8 + $0x38] sm:$0xf0]  ;;  %v1010_v6 = vor.u32 %v1266_v3, %v1009_v1  ;;  %v1265_v8 = vld [vmem:[#allocation8 + $0xb4] sm:$0xf]  ;;  %v937_v11 = vld [vmem:[#allocation8 + $0x20] sm:$0xf] }
  0x2d   :  { %v950_v7 = vor.u32 %v1249_v4, %v947_v5  ;;  %v1011_v9 = vld [vmem:[#allocation8 + $0xb8] sm:$0xf0]  ;;  %v1248_v12 = vld [vmem:[#allocation8 + $0x24] sm:$0xf0]  ;;  %v1001_v14 = vld [vmem:[#allocation8 + $0xa0] sm:$0xf] }
  0x2e   :  { %v1014_v10 = vor.u32 %v1265_v8, %v1011_v9  ;;  %v938_v13 = vor.u32 %v1248_v12, %v937_v11  ;;  %v1264_v15 = vld [vmem:[#allocation8 + $0xa4] sm:$0xf0]  ;;  %v1247_v16 = vld [vmem:[#allocation8 + $0x24] sm:$0xf]  ;;  %v939_v18 = vld [vmem:[#allocation8 + $0x28] sm:$0xf0] }
  0x2f   :  { %425 = vmatpush.bf16.msrb.mxu0 %v966_v51  ;;  %398 = vmatpush.bf16.msra.mxu2 %v954_v57  ;;  %v1002_v17 = vor.u32 %v1264_v15, %v1001_v14  ;;  %v1263_v19 = vld [vmem:[#allocation8 + $0xa4] sm:$0xf]  ;;  %v1003_v20 = vld [vmem:[#allocation8 + $0xa8] sm:$0xf0]  ;;  %v942_v21 = vor.u32 %v1247_v16, %v939_v18  ;;  %v929_v23 = vld [vmem:[#allocation8 + $0x10] sm:$0xf] }
  0x30   :  { %439 = vmatpush.bf16.msrb.mxu1 %v1030_v54  ;;  %412 = vmatpush.bf16.msra.mxu3 %v1018_v60  ;;  %v1006_v22 = vor.u32 %v1263_v19, %v1003_v20  ;;  %v1246_v24 = vld [vmem:[#allocation8 + $0x14] sm:$0xf0]  ;;  %v993_v25 = vld [vmem:[#allocation8 + $0x90] sm:$0xf]  ;;  %v1245_v28 = vld [vmem:[#allocation8 + $0x14] sm:$0xf] }
  0x31   :  { %v930_v26 = vor.u32 %v1246_v24, %v929_v23  ;;  %v1262_v27 = vld [vmem:[#allocation8 + $0x94] sm:$0xf0]  ;;  %v931_v29 = vld [vmem:[#allocation8 + $0x18] sm:$0xf0]  ;;  %v1261_v32 = vld [vmem:[#allocation8 + $0x94] sm:$0xf] }
  0x32   :  { %v994_v30 = vor.u32 %v1262_v27, %v993_v25  ;;  %v934_v31 = vor.u32 %v1245_v28, %v931_v29  ;;  %v995_v33 = vld [vmem:[#allocation8 + $0x98] sm:$0xf0]  ;;  %v921_v35 = vld [vmem:[#allocation8] sm:$0xf]  ;;  %v1244_v36 = vld [vmem:[#allocation8 + $0x4] sm:$0xf0] }
  0x33   :  { %426 = vmatpush.bf16.msrb.mxu0 %v958_v61  ;;  %399 = vmatpush.bf16.msra.mxu2 %v946_v2  ;;  %v998_v34 = vor.u32 %v1261_v32, %v995_v33  ;;  %v985_v37 = vld [vmem:[#allocation8 + $0x80] sm:$0xf]  ;;  %v922_v38 = vor.u32 %v1244_v36, %v921_v35  ;;  %v1260_v39 = vld [vmem:[#allocation8 + $0x84] sm:$0xf0]  ;;  %v1243_v40 = vld [vmem:[#allocation8 + $0x4] sm:$0xf] }
  0x34   :  { %440 = vmatpush.bf16.msrb.mxu1 %v1022_v62  ;;  %413 = vmatpush.bf16.msra.mxu3 %v1010_v6  ;;  %v923_v41 = vld [vmem:[#allocation8 + $0x8] sm:$0xf0]  ;;  %v986_v42 = vor.u32 %v1260_v39, %v985_v37  ;;  %v1259_v44 = vld [vmem:[#allocation8 + $0x84] sm:$0xf]  ;;  %v1169_v47 = vld [vmem:[#allocation10 + $0xf0] sm:$0xf] }
  0x35   :  { %v926_v43 = vor.u32 %v1243_v40, %v923_v41  ;;  %v987_v45 = vld [vmem:[#allocation8 + $0x88] sm:$0xf0]  ;;  %v1306_v48 = vld [vmem:[#allocation10 + $0xf4] sm:$0xf0]  ;;  %v1305_v49 = vld [vmem:[#allocation10 + $0xf4] sm:$0xf] }
  0x36   :  { %v990_v46 = vor.u32 %v1259_v44, %v987_v45  ;;  %v1170_v50 = vor.u32 %v1306_v48, %v1169_v47  ;;  %v1171_v51 = vld [vmem:[#allocation10 + $0xf8] sm:$0xf0]  ;;  %v1161_v52 = vld [vmem:[#allocation10 + $0xe0] sm:$0xf]  ;;  %v1304_v53 = vld [vmem:[#allocation10 + $0xe4] sm:$0xf0] }
  0x37   :  { %427 = vmatpush.bf16.msrb.mxu0 %v950_v7  ;;  %400 = vmatpush.bf16.msra.mxu2 %v938_v13  ;;  %v1174_v54 = vor.u32 %v1305_v49, %v1171_v51  ;;  %v1303_v55 = vld [vmem:[#allocation10 + $0xe4] sm:$0xf]  ;;  %v1163_v56 = vld [vmem:[#allocation10 + $0xe8] sm:$0xf0]  ;;  %v1105_v57 = vld [vmem:[#allocation10 + $0x70] sm:$0xf]  ;;  %v1162_v58 = vor.u32 %v1304_v53, %v1161_v52 }
  0x38   :  { %441 = vmatpush.bf16.msrb.mxu1 %v1014_v10  ;;  %414 = vmatpush.bf16.msra.mxu3 %v1002_v17  ;;  %v1290_v59 = vld [vmem:[#allocation10 + $0x74] sm:$0xf0]  ;;  %v1289_v60 = vld [vmem:[#allocation10 + $0x74] sm:$0xf]  ;;  %v1107_v61 = vld [vmem:[#allocation10 + $0x78] sm:$0xf0]  ;;  %v1166_v62 = vor.u32 %v1303_v55, %v1163_v56 }
  0x39   :  { %v1106_v63 = vor.u32 %v1290_v59, %v1105_v57  ;;  %v1110_v0 = vor.u32 %v1289_v60, %v1107_v61  ;;  %v1153_v1 = vld [vmem:[#allocation10 + $0xd0] sm:$0xf]  ;;  %v1302_v2 = vld [vmem:[#allocation10 + $0xd4] sm:$0xf0]  ;;  %v1301_v3 = vld [vmem:[#allocation10 + $0xd4] sm:$0xf] }
  0x3a   :  { %v1155_v4 = vld [vmem:[#allocation10 + $0xd8] sm:$0xf0]  ;;  %v1097_v5 = vld [vmem:[#allocation10 + $0x60] sm:$0xf]  ;;  %v1288_v6 = vld [vmem:[#allocation10 + $0x64] sm:$0xf0]  ;;  %v1154_v10 = vor.u32 %v1302_v2, %v1153_v1 }
  0x3b   :  { %428 = vmatpush.bf16.msrb.mxu0 %v942_v21  ;;  %401 = vmatpush.bf16.msra.mxu2 %v930_v26  ;;  %v1098_v7 = vor.u32 %v1288_v6, %v1097_v5  ;;  %v1287_v8 = vld [vmem:[#allocation10 + $0x64] sm:$0xf]  ;;  %v1099_v9 = vld [vmem:[#allocation10 + $0x68] sm:$0xf0]  ;;  %v1158_v12 = vor.u32 %v1301_v3, %v1155_v4  ;;  %v1145_v13 = vld [vmem:[#allocation10 + $0xc0] sm:$0xf] }
  0x3c   :  { %442 = vmatpush.bf16.msrb.mxu1 %v1006_v22  ;;  %415 = vmatpush.bf16.msra.mxu3 %v994_v30  ;;  %v1102_v11 = vor.u32 %v1287_v8, %v1099_v9  ;;  %v1300_v14 = vld [vmem:[#allocation10 + $0xc4] sm:$0xf0]  ;;  %v1299_v15 = vld [vmem:[#allocation10 + $0xc4] sm:$0xf]  ;;  %v1147_v16 = vld [vmem:[#allocation10 + $0xc8] sm:$0xf0] }
  0x3d   :  { %v1146_v17 = vor.u32 %v1300_v14, %v1145_v13  ;;  %v1150_v18 = vor.u32 %v1299_v15, %v1147_v16  ;;  %v133_v19 = vld [vmem:[#allocation7] sm:$0x3]  ;;  %v1089_v36 = vld [vmem:[#allocation10 + $0x50] sm:$0xf]  ;;  %v1286_v37 = vld [vmem:[#allocation10 + $0x54] sm:$0xf0] }
  0x3e   :  { %v135_v22 = vperm.slane %v133_v19, 0  ;;  %v136_v23 = vperm.slane %v133_v19, 1  ;;  %v1090_v39 = vor.u32 %v1286_v37, %v1089_v36  ;;  %v1091_v40 = vld [vmem:[#allocation10 + $0x58] sm:$0xf0]  ;;  %v1297_v44 = vld [vmem:[#allocation10 + $0xb4] sm:$0xf] }
  0x3f   :  { %429 = vmatpush.bf16.msrb.mxu0 %v934_v31  ;;  %402 = vmatpush.bf16.msra.mxu2 %v922_v38  ;;  %v1285_v38 = vld [vmem:[#allocation10 + $0x54] sm:$0xf]  ;;  %v1081_v48 = vld [vmem:[#allocation10 + $0x40] sm:$0xf]  ;;  %v1284_v49 = vld [vmem:[#allocation10 + $0x44] sm:$0xf0] }
  0x40   :  { %443 = vmatpush.bf16.msrb.mxu1 %v998_v34  ;;  %416 = vmatpush.bf16.msra.mxu3 %v986_v42  ;;  %v1094_v41 = vor.u32 %v1285_v38, %v1091_v40  ;;  %v1137_v42 = vld [vmem:[#allocation10 + $0xb0] sm:$0xf]  ;;  %v1082_v51 = vor.u32 %v1284_v49, %v1081_v48  ;;  %v1083_v52 = vld [vmem:[#allocation10 + $0x48] sm:$0xf0]  ;;  %v1296_v55 = vld [vmem:[#allocation10 + $0xa4] sm:$0xf0] }
  0x41   :  { %v1295_v56 = vld [vmem:[#allocation10 + $0xa4] sm:$0xf]  ;;  %v1073_v60 = vld [vmem:[#allocation10 + $0x30] sm:$0xf]  ;;  %v1282_v61 = vld [vmem:[#allocation10 + $0x34] sm:$0xf0] }
  0x42   :  { %v1121_v2 = vld [vmem:[#allocation10 + $0x90] sm:$0xf]  ;;  %v1294_v3 = vld [vmem:[#allocation10 + $0x94] sm:$0xf0]  ;;  %v1293_v4 = vld [vmem:[#allocation10 + $0x94] sm:$0xf] }
  0x43   :  { %430 = vmatpush.bf16.msrb.mxu0 %v926_v43  ;;  %655 = vmatpush.bf16.msrb.mxu2 %v1106_v63  ;;  %v1298_v43 = vld [vmem:[#allocation10 + $0xb4] sm:$0xf0]  ;;  %v1074_v63 = vor.u32 %v1282_v61, %v1073_v60  ;;  %v1122_v5 = vor.u32 %v1294_v3, %v1121_v2  ;;  %v1123_v6 = vld [vmem:[#allocation10 + $0x98] sm:$0xf0]  ;;  %v1065_v8 = vld [vmem:[#allocation10 + $0x20] sm:$0xf] }
  0x44   :  { %444 = vmatpush.bf16.msrb.mxu1 %v990_v46  ;;  %669 = vmatpush.bf16.msrb.mxu3 %v1170_v50  ;;  %v1138_v45 = vor.u32 %v1298_v43, %v1137_v42  ;;  %v1139_v46 = vld [vmem:[#allocation10 + $0xb8] sm:$0xf0]  ;;  %v1283_v50 = vld [vmem:[#allocation10 + $0x44] sm:$0xf]  ;;  %v1280_v9 = vld [vmem:[#allocation10 + $0x24] sm:$0xf0] }
  0x45   :  { %v1142_v47 = vor.u32 %v1297_v44, %v1139_v46  ;;  %v1086_v53 = vor.u32 %v1283_v50, %v1083_v52  ;;  %v1113_v14 = vld [vmem:[#allocation10 + $0x80] sm:$0xf]  ;;  %v1292_v15 = vld [vmem:[#allocation10 + $0x84] sm:$0xf0]  ;;  %v1291_v16 = vld [vmem:[#allocation10 + $0x84] sm:$0xf] }
  0x46   :  { %v1320_v60 = vld [vmem:[#allocation11 + $0x68] sm:$0xff]  ;;  %v1313_v61 = vld [vmem:[#allocation11 + $0x30] sm:$0xff]  ;;  %v1310_v3 = vld [vmem:[#allocation11 + $0x18] sm:$0xff]  ;;  %s883_s1 = sshll.u32 %s1523_s22, 4  ;;  %s885_s24 = sshll.u32 %s1630_s9, 4  ;;  %s884_s1 = int_to_ptr.vmem [resolvable:$true] %s883_s1  ;;  %s886_s24 = int_to_ptr.hbm [resolvable:$true] %s885_s24 }
  0x47   :  { %683 = vmatpush.bf16.msra.mxu0 %v1110_v0  ;;  %656 = vmatpush.bf16.msrb.mxu2 %v1098_v7  ;;  %v1075_v0 = vld [vmem:[#allocation10 + $0x38] sm:$0xf0]  ;;  %v1126_v7 = vor.u32 %v1293_v4, %v1123_v6  ;;  %v1317_v2 = vld [vmem:[#allocation11 + $0x50] sm:$0xff]  ;;  %v1316_v4 = vld [vmem:[#allocation11 + $0x48] sm:$0xff] }
  0x48   :  { %697 = vmatpush.bf16.msra.mxu1 %v1174_v54  ;;  %670 = vmatpush.bf16.msrb.mxu3 %v1162_v58  ;;  %v1129_v54 = vld [vmem:[#allocation10 + $0xa0] sm:$0xf]  ;;  %v1131_v58 = vld [vmem:[#allocation10 + $0xa8] sm:$0xf0] }
  0x49   :  { %v1130_v57 = vor.u32 %v1296_v55, %v1129_v54  ;;  %v1134_v59 = vor.u32 %v1295_v56, %v1131_v58  ;;  %v1315_v6 = vld [vmem:[#allocation11 + $0x40] sm:$0xff] }
  0x4b   :  { %684 = vmatpush.bf16.msra.mxu0 %v1102_v11  ;;  %657 = vmatpush.bf16.msrb.mxu2 %v1090_v39  ;;  %v1066_v11 = vor.u32 %v1280_v9, %v1065_v8  ;;  %v1307_v8 = vld [vmem:[#allocation11] sm:$0xff]  ;;  %v489_v9 = vld [vmem:[%s1627_s6] sm:$0x3] }
  0x4c   :  { %698 = vmatpush.bf16.msra.mxu1 %v1166_v62  ;;  %671 = vmatpush.bf16.msrb.mxu3 %v1154_v10  ;;  %v1281_v62 = vld [vmem:[#allocation10 + $0x34] sm:$0xf]  ;;  %v1279_v10 = vld [vmem:[#allocation10 + $0x24] sm:$0xf] }
  0x4d   :  { %v1078_v1 = vor.u32 %v1281_v62, %v1075_v0  ;;  %v1319_v62 = vld [vmem:[#allocation11 + $0x60] sm:$0xff]  ;;  %v1318_v0 = vld [vmem:[#allocation11 + $0x58] sm:$0xff] }
  0x4f   :  { %685 = vmatpush.bf16.msra.mxu0 %v1094_v41  ;;  %658 = vmatpush.bf16.msrb.mxu2 %v1082_v51 }
  0x50   :  { %699 = vmatpush.bf16.msra.mxu1 %v1158_v12  ;;  %672 = vmatpush.bf16.msrb.mxu3 %v1146_v17  ;;  %v1067_v12 = vld [vmem:[#allocation10 + $0x28] sm:$0xf0]  ;;  %v1114_v17 = vor.u32 %v1292_v15, %v1113_v14 }
  0x51   :  { %v1070_v13 = vor.u32 %v1279_v10, %v1067_v12  ;;  %v492_v12 = vperm.slane %v489_v9, 1 }
  0x53   :  { %686 = vmatpush.bf16.msra.mxu0 %v1086_v53  ;;  %659 = vmatpush.bf16.msrb.mxu2 %v1074_v63  ;;  %v1312_v63 = vld [vmem:[#allocation11 + $0x28] sm:$0xff] }
  0x54   :  { %700 = vmatpush.bf16.msra.mxu1 %v1150_v18  ;;  %673 = vmatpush.bf16.msrb.mxu3 %v1138_v45  ;;  %v1115_v18 = vld [vmem:[#allocation10 + $0x88] sm:$0xf0] }
  0x55   :  { %v1118_v19 = vor.u32 %v1291_v16, %v1115_v18  ;;  %v491_v16 = vperm.slane %v489_v9, 0 }
  0x57   :  { %687 = vmatpush.bf16.msra.mxu0 %v1078_v1  ;;  %660 = vmatpush.bf16.msrb.mxu2 %v1066_v11  ;;  %v1311_v1 = vld [vmem:[#allocation11 + $0x20] sm:$0xff] }
  0x58   :  { %701 = vmatpush.bf16.msra.mxu1 %v1142_v47  ;;  %674 = vmatpush.bf16.msrb.mxu3 %v1130_v57 }
  0x5b   :  { %688 = vmatpush.bf16.msra.mxu0 %v1070_v13 }
  0x5c   :  { %702 = vmatpush.bf16.msra.mxu1 %v1134_v59  ;;  %675 = vmatpush.bf16.msrb.mxu3 %v1122_v5  ;;  %v1309_v5 = vld [vmem:[#allocation11 + $0x10] sm:$0xff] }
  0x60   :  { %703 = vmatpush.bf16.msra.mxu1 %v1126_v7  ;;  %676 = vmatpush.bf16.msrb.mxu3 %v1114_v17  ;;  %v1308_v7 = vld [vmem:[#allocation11 + $0x8] sm:$0xff] }
  0x64   :  { %704 = vmatpush.bf16.msra.mxu1 %v1118_v19 }
  0xa3   :  { %v172_v20 = vpop.f32.mrf.mxu0 }
  0xa4   :  { %v173_v24 = vadd.f32 %v172_v20, %v135_v22  ;;  %v1057_v20 = vld [vmem:[#allocation10 + $0x10] sm:$0xf] }
  0xa6   :  { %v186_v21 = vpop.f32.mrf.mxu1  ;;  %v191_v30 = vmax.f32 %v173_v24, 0.0  ;;  %v1059_v24 = vld [vmem:[#allocation10 + $0x18] sm:$0xf0] }
  0xa7   :  { %v187_v25 = vadd.f32 %v186_v21, %v136_v23  ;;  %v1278_v21 = vld [vmem:[#allocation10 + $0x14] sm:$0xf0] }
  0xa9   :  { %v192_v32 = vmax.f32 %v187_v25, 0.0 }
  0xab   :  { %v174_v26 = vpop.f32.mrf.mxu0 }
  0xac   :  { %v175_v27 = vadd.f32 %v174_v26, %v135_v22  ;;  %v1277_v22 = vld [vmem:[#allocation10 + $0x14] sm:$0xf]  ;;  %v1049_v26 = vld [vmem:[#allocation10] sm:$0xf] }
  0xad   :  { %v1062_v25 = vor.u32 %v1277_v22, %v1059_v24 }
  0xae   :  { %v188_v28 = vpop.f32.mrf.mxu1  ;;  %v193_v31 = vmax.f32 %v175_v27, 0.0  ;;  %v1276_v27 = vld [vmem:[#allocation10 + $0x4] sm:$0xf0] }
  0xaf   :  { %v189_v29 = vadd.f32 %v188_v28, %v136_v23  ;;  %v1058_v23 = vor.u32 %v1278_v21, %v1057_v20  ;;  %689 = vmatpush.bf16.msra.mxu0 %v1062_v25  ;;  %v1275_v28 = vld [vmem:[#allocation10 + $0x4] sm:$0xf] }
  0xb0   :  { %v195_v34 = vpack.c.bf16 %v193_v31, %v191_v30  ;;  %v1051_v30 = vld [vmem:[#allocation10 + $0x8] sm:$0xf0] }
  0xb1   :  { %v194_v33 = vmax.f32 %v189_v29, 0.0  ;;  %661 = vmatpush.bf16.msrb.mxu2 %v1058_v23  ;;  %v1050_v29 = vor.u32 %v1276_v27, %v1049_v26  ;;  %v1054_v31 = vor.u32 %v1275_v28, %v1051_v30 }
  0xb2   :  { %403 = vmatmul.bf16.vlgmr.msra.gmra.mxu2 %v195_v34  ;;  %431 = vmatmul.bf16.vlgmr.msrb.gmra.mxu0 %v195_v34  ;;  %v1321_v34 = vld [vmem:[#allocation11 + $0x70] sm:$0xff] }
  0xb3   :  { %v196_v35 = vpack.c.bf16 %v194_v33, %v192_v32  ;;  %690 = vmatpush.bf16.msra.mxu0 %v1054_v31  ;;  %v1322_v32 = vld [vmem:[#allocation11 + $0x78] sm:$0xff] }
  0xb4   :  { %v1314_v33 = vld [vmem:[#allocation11 + $0x38] sm:$0xff] }
  0xb5   :  { %417 = vmatmul.bf16.vlgmr.msra.gmra.mxu3 %v196_v35  ;;  %445 = vmatmul.bf16.vlgmr.msrb.gmra.mxu1 %v196_v35  ;;  %v229_v35 = vld [vmem:[%s1625_s4] sm:$0x3] }
  0xb6   :  { %662 = vmatpush.bf16.msrb.mxu2 %v1050_v29  ;;  %863 = vmatpush.bf16.msra.mxu3 %v1322_v32  ;;  %v232_v37 = vperm.slane %v229_v35, 1  ;;  %v231_v41 = vperm.slane %v229_v35, 0 }
  0xba   :  { %849 = vmatpush.bf16.msra.mxu2 %v1314_v33  ;;  %864 = vmatpush.bf16.msra.mxu3 %v1321_v34  ;;  %v1334_v34 = vld [vmem:[%s1629_s8] ss:$0 sm:$0xff] }
  0xbe   :  { %865 = vmatpush.bf16.msra.mxu3 %v1320_v60  ;;  %850 = vmatpush.bf16.msra.mxu2 %v1313_v61 }
  0xc2   :  { %866 = vmatpush.bf16.msra.mxu3 %v1319_v62  ;;  %851 = vmatpush.bf16.msra.mxu2 %v1312_v63 }
  0xc6   :  { %867 = vmatpush.bf16.msra.mxu3 %v1318_v0  ;;  %852 = vmatpush.bf16.msra.mxu2 %v1311_v1 }
  0xca   :  { %868 = vmatpush.bf16.msra.mxu3 %v1317_v2  ;;  %853 = vmatpush.bf16.msra.mxu2 %v1310_v3 }
  0xce   :  { %869 = vmatpush.bf16.msra.mxu3 %v1316_v4  ;;  %854 = vmatpush.bf16.msra.mxu2 %v1309_v5 }
  0xd2   :  { %870 = vmatpush.bf16.msra.mxu3 %v1315_v6  ;;  %855 = vmatpush.bf16.msra.mxu2 %v1308_v7 }
  0xd6   :  { %856 = vmatpush.bf16.msra.mxu2 %v1307_v8 }
 0x12f   :  { %v432_v36 = vpop.f32.mrf.mxu0 }
 0x130   :  { %v433_v39 = vadd.f32 %v432_v36, %v232_v37 }
 0x132   :  { %v446_v38 = vpop.f32.mrf.mxu1 }
 0x133   :  { %v447_v44 = vadd.f32 %v446_v38, %v433_v39 }
 0x135   :  { %v404_v40 = vpop.f32.mrf.mxu2  ;;  %v452_v49 = vmax.f32 %v447_v44, 0.0 }
 0x136   :  { %v405_v47 = vadd.f32 %v404_v40, %v231_v41 }
 0x137   :  { %v434_v43 = vpop.f32.mrf.mxu0 }
 0x138   :  { %v418_v42 = vpop.f32.mrf.mxu3  ;;  %v435_v45 = vadd.f32 %v434_v43, %v232_v37 }
 0x139   :  { %v419_v52 = vadd.f32 %v418_v42, %v405_v47 }
 0x13a   :  { %v448_v46 = vpop.f32.mrf.mxu1 }
 0x13b   :  { %v449_v48 = vadd.f32 %v448_v46, %v435_v45  ;;  %v451_v57 = vmax.f32 %v419_v52, 0.0 }
 0x13d   :  { %v454_v50 = vmax.f32 %v449_v48, 0.0  ;;  %v406_v51 = vpop.f32.mrf.mxu2 }
 0x13e   :  { %v407_v54 = vadd.f32 %v406_v51, %v231_v41 }
 0x13f   :  { %v456_v53 = vpack.c.bf16 %v454_v50, %v452_v49 }
 0x140   :  { %v420_v55 = vpop.f32.mrf.mxu3 }
 0x141   :  { %v421_v56 = vadd.f32 %v420_v55, %v407_v54  ;;  %677 = vmatmul.bf16.vlgmr.msrb.gmra.mxu3 %v456_v53  ;;  %705 = vmatmul.bf16.vlgmr.msra.gmra.mxu1 %v456_v53 }
 0x143   :  { %v453_v58 = vmax.f32 %v421_v56, 0.0 }
 0x145   :  { %v455_v59 = vpack.c.bf16 %v453_v58, %v451_v57 }
 0x147   :  { %663 = vmatmul.bf16.vlgmr.msrb.gmra.mxu2 %v455_v59  ;;  %691 = vmatmul.bf16.vlgmr.msra.gmra.mxu0 %v455_v59 }
 0x1be   :  { %v706_v10 = vpop.f32.mrf.mxu1 }
 0x1c4   :  { %v692_v11 = vpop.f32.mrf.mxu0  ;;  %v678_v14 = vpop.f32.mrf.mxu3 }
 0x1c5   :  { %v693_v13 = vadd.f32 %v692_v11, %v492_v12 }
 0x1c6   :  { %v708_v20 = vpop.f32.mrf.mxu1 }
 0x1c7   :  { %v707_v18 = vadd.f32 %v706_v10, %v693_v13 }
 0x1c9   :  { %v712_v23 = vmax.f32 %v707_v18, 0.0 }
 0x1ca   :  { %v664_v15 = vpop.f32.mrf.mxu2 }
 0x1cb   :  { %v665_v21 = vadd.f32 %v664_v15, %v491_v16 }
 0x1cc   :  { %v694_v17 = vpop.f32.mrf.mxu0  ;;  %v680_v29 = vpop.f32.mrf.mxu3 }
 0x1cd   :  { %v695_v19 = vadd.f32 %v694_v17, %v492_v12  ;;  %v679_v26 = vadd.f32 %v678_v14, %v665_v21 }
 0x1cf   :  { %v709_v22 = vadd.f32 %v708_v20, %v695_v19  ;;  %v711_v31 = vmax.f32 %v679_v26, 0.0 }
 0x1d1   :  { %v714_v24 = vmax.f32 %v709_v22, 0.0 }
 0x1d2   :  { %v666_v25 = vpop.f32.mrf.mxu2 }
 0x1d3   :  { %v716_v27 = vpack.c.bf16 %v714_v24, %v712_v23  ;;  %v667_v28 = vadd.f32 %v666_v25, %v491_v16 }
 0x1d5   :  { %v681_v30 = vadd.f32 %v680_v29, %v667_v28  ;;  %871 = vmatmul.bf16.vlgmr.msra.gmra.mxu3 %v716_v27 }
 0x1d7   :  { %v713_v32 = vmax.f32 %v681_v30, 0.0 }
 0x1d9   :  { %v715_v33 = vpack.c.bf16 %v713_v32, %v711_v31 }
 0x1db   :  { %857 = vmatmul.bf16.vlgmr.msra.gmra.mxu2 %v715_v33 }
 0x258   :  { %v872_v35 = vpop.f32.mrf.mxu3 }
 0x25e   :  { %v858_v36 = vpop.f32.mrf.mxu2 }
 0x25f   :  { %v859_v37 = vadd.f32 %v1334_v34, %v858_v36 }
 0x260   :  { %v874_v41 = vpop.f32.mrf.mxu3 }
 0x261   :  { %v873_v38 = vadd.f32 %v872_v35, %v859_v37 }
 0x263   :  { %877 = vst [vmem:[#allocation13] sm:$0xff] %v873_v38 }
 0x266   :  { %v860_v39 = vpop.f32.mrf.mxu2 }
 0x267   :  { %v861_v40 = vadd.f32 %v1334_v34, %v860_v39 }
 0x269   :  { %v875_v42 = vadd.f32 %v874_v41, %v861_v40 }
 0x26b   :  { %878 = vst [vmem:[#allocation13 + $0x8] sm:$0xff] %v875_v42 }
 0x26c   :  { %891 = dma.vmem_to_hbm [thread:$0]  %s884_s1, 256, %s886_s24, [#allocation4], %s1514_s17, %s1514_s17, %s1515_s18  }
 0x26d   :  { %1511 = dma.done.wait [#allocation4], 256  }
 0x26e   :  { %1512 = vsyncadd [#allocation4], 4294967040 }
 0x26f   :  { %896 = vsyncpa [#allocation3], 1 }
 0x270   :  { %897 = vsyncpa [#allocation6], 1 }
 0x271   :  { %898 = vsyncpa [#allocation9], 1 }
 0x272   :  { %899 = vsyncpa [#allocation12], 1 }
 0x273   :  { %900 = vsyncpa [#allocation4], 1 }

</bundles_post_ra>
